<compile_context>
chip_gen: v5e
topology: v5e:2x2
jax: 0.10.0
libtpu: 0.0.40
codegen_flags: <defaults>
</compile_context>

<pallas_src>
import jax
import jax.numpy as jnp
from jax.experimental import pallas as pl
from jax.experimental.pallas import tpu as pltpu

_LANE = 128        # lane width / sequence bucket granularity
_HEADS_PAD = 8     # 3 heads zero-padded to a full sublane group
_MAX_ROWS_TILE = 2048


def _heads_kernel(lhs_ref, w_ref, b_ref, out_ref):
    # lhs_ref: (rows_tile, H) bf16 ; w_ref: (8, H) bf16 ; b_ref: (8, 1) f32 ;
    # out_ref: (8, rows_tile) f32.
    # Contract both operands on their last (lane) dim H -> (8, rows_tile)
    # directly: no relayout of the big lhs tile, no sparse (rows_tile, 8)
    # intermediate, no result transpose.  Bias is fused into the epilogue.
    acc = jax.lax.dot_general(
        w_ref[...], lhs_ref[...],
        dimension_numbers=(((1,), (1,)), ((), ())),
        preferred_element_type=jnp.float32)
    out_ref[...] = (acc + b_ref[...]).astype(out_ref.dtype)


def _pick_rows_tile(rows):
    """Largest multiple of 128 (<= 2048) dividing `rows`, keeping >= 2 steps."""
    cap = min(_MAX_ROWS_TILE, rows)
    if rows >= 2 * _LANE:
        cap = min(cap, rows // 2)       # keep >= 2 grid steps (v7x megacore)
    cap -= cap % _LANE
    for t in range(cap, _LANE - 1, -_LANE):
        if rows % t == 0:
            return t
    return _LANE


def node_edge_heads(lhs, w, b):
    """lhs: [B, S_pad, H] (S_pad a multiple of 128), w: [3, H], b: [3, 1].

    Returns logits [B, 8, S_pad] float32 with bias added; rows 3..7 are zero.
    """
    B, S, H = lhs.shape
    n_heads = w.shape[0]
    assert S % _LANE == 0, "sequence length must be bucketed to a multiple of 128"
    rows = B * S

    # Pad the 3 head weights/biases to 8 rows; weights follow the lhs dtype
    # (bf16 MXU path, f32 accumulation).
    w_pad = jnp.zeros((_HEADS_PAD, H), dtype=lhs.dtype).at[:n_heads].set(
        w.astype(lhs.dtype))
    b_pad = jnp.zeros((_HEADS_PAD, 1), dtype=jnp.float32).at[:n_heads].set(
        jnp.reshape(b, (n_heads, 1)).astype(jnp.float32))

    # Flatten (B, S_pad) into one row axis: uniform, large, contiguous DMA
    # reads independent of B, and one fully lane-dense output slab.
    lhs2 = lhs.reshape(rows, H)

    rows_tile = _pick_rows_tile(rows)
    num_steps = rows // rows_tile
    grid = (num_steps,)

    lhs_spec_kwargs = {}
    if rows_tile <= 256 and num_steps >= 3:
        # Small per-step transfers: deepen prefetch to hide DMA issue latency.
        lhs_spec_kwargs["pipeline_mode"] = pl.Buffered(3)
    lhs_spec = pl.BlockSpec((rows_tile, H), lambda ri: (ri, 0), **lhs_spec_kwargs)

    cost = pl.CostEstimate(
        flops=2 * rows * H * n_heads,               # 3 real heads, not 8 padded
        transcendentals=0,
        bytes_accessed=(lhs2.size * lhs2.dtype.itemsize
                        + w_pad.size * w_pad.dtype.itemsize
                        + _HEADS_PAD * rows * 4),
    )

    out = pl.pallas_call(
        _heads_kernel,
        out_shape=jax.ShapeDtypeStruct((_HEADS_PAD, rows), jnp.float32),
        grid=grid,
        in_specs=[
            lhs_spec,                                              # big lhs tile
            pl.BlockSpec((_HEADS_PAD, H), lambda ri: (0, 0)),      # head weights (resident)
            pl.BlockSpec((_HEADS_PAD, 1), lambda ri: (0, 0)),      # head biases (resident)
        ],
        out_specs=pl.BlockSpec((_HEADS_PAD, rows_tile), lambda ri: (0, ri)),
        compiler_params=pltpu.CompilerParams(
            dimension_semantics=("parallel",)),
        cost_estimate=cost,
    )(lhs2, w_pad, b_pad)

    # (8, B*S_pad) -> (B, 8, S_pad); tiny XLA transpose over the logits only.
    return jnp.transpose(out.reshape(_HEADS_PAD, B, S), (1, 0, 2))


def node_edge_detector_forward(x, emb_table, w, b, clip_len=True, seq_lengths=None):
    """x: [B, S] int32 token ids (0 = pad). Returns logits [B, 3, maxlen] f32.

    `seq_lengths` (host-side ints, optional): when given, the clipped length is
    derived on the host and no device->host sync stalls the dispatch pipeline.
    """
    B, S = x.shape
    if clip_len:
        if seq_lengths is not None:
            maxlen = min(S, int(max(seq_lengths)) + 1)
        else:
            # Fallback mirrors torch's `.item()`; serializes dispatch -- prefer
            # passing host-known seq_lengths in hot loops.
            maxlen = int(jax.device_get(jnp.max(jnp.sum(x != 0, axis=1))))
            maxlen = min(S, maxlen + 1)
    else:
        maxlen = S

    # Bucket the kernel sequence length up to a multiple of 128: lane-dense,
    # unmasked output stores and at most ceil(S/128) distinct Mosaic compiles.
    s_pad = max(_LANE, ((maxlen + _LANE - 1) // _LANE) * _LANE)
    if s_pad > S:
        x = jnp.pad(x, ((0, 0), (0, s_pad - S)))
    else:
        x = x[:, :s_pad]

    # TODO(synk): the pre-trained BERT backbone is external and not reimplemented;
    # a deterministic bf16 embedding lookup stands in for
    # bert(x, attention_mask=(x != 0)).last_hidden_state.
    lhs = jnp.take(emb_table, x, axis=0)          # [B, s_pad, H] bf16

    logits8 = node_edge_heads(lhs, w, b)          # [B, 8, s_pad] f32, bias fused
    return logits8[:, :3, :maxlen]                # drop head/sequence padding


if __name__ == "__main__":
    B, S, H, VOCAB = 2, 16, 32, 64

    key = jax.random.PRNGKey(0)
    k_x, k_emb, k_w, k_b = jax.random.split(key, 4)

    # Token ids with trailing padding (zeros) so clip_len has an effect.
    x = jax.random.randint(k_x, (B, S), minval=1, maxval=VOCAB, dtype=jnp.int32)
    host_lengths = [10, 7]                         # host-known -> no device sync
    lengths = jnp.array(host_lengths, dtype=jnp.int32)
    pos = jnp.arange(S)[None, :]
    x = jnp.where(pos < lengths[:, None], x, 0)

    # Parameters: bf16 embedding stand-in, Linear(H,1) x 3 -> stacked [3,H] / [3,1].
    emb_table = (0.1 * jax.random.normal(k_emb, (VOCAB, H), dtype=jnp.float32)
                 ).astype(jnp.bfloat16)
    w = 0.02 * jax.random.normal(k_w, (3, H), dtype=jnp.float32)
    b = 0.02 * jax.random.normal(k_b, (3, 1), dtype=jnp.float32)

    logits = node_edge_detector_forward(x, emb_table, w, b, clip_len=True,
                                        seq_lengths=host_lengths)
    logits = jax.block_until_ready(logits)

    # Reference check in plain JAX (same bf16 inputs, f32 accumulation).
    maxlen = min(S, max(host_lengths) + 1)
    lhs_ref = jnp.take(emb_table, x[:, :maxlen], axis=0).astype(jnp.float32)
    w_ref = w.astype(jnp.bfloat16).astype(jnp.float32)
    ref = jnp.einsum("bsh,ih->bis", lhs_ref, w_ref) + b[None, :, :]

    assert logits.shape == (B, 3, maxlen), logits.shape
    assert jnp.allclose(logits, ref, atol=1e-4, rtol=1e-4), (
        float(jnp.max(jnp.abs(logits - ref))))

    print("KERNEL_OK")
</pallas_src>

<mosaic_0001>
module attributes {stable_mosaic.version = 11 : i64} {
  func.func @_heads_kernel(%arg0: i32, %arg1: memref<128x32xbf16, #tpu.memory_space<vmem>>, %arg2: memref<8x32xbf16, #tpu.memory_space<vmem>>, %arg3: memref<8x1xf32, #tpu.memory_space<vmem>>, %arg4: memref<8x128xf32, #tpu.memory_space<vmem>>) attributes {dimension_semantics = [#tpu.dimension_semantics<parallel>], iteration_bounds = array<i64: 2>, scalar_prefetch = 0 : i64, scratch_operands = 0 : i64, tpu.core_type = #tpu.core_type<tc>, window_params = [{transform_indices = @transform_0, window_bounds = array<i64: 128, 32>}, {pipeline_mode = #tpu.pipeline_mode<synchronous>, transform_indices = @transform_1, window_bounds = array<i64: 8, 32>}, {pipeline_mode = #tpu.pipeline_mode<synchronous>, transform_indices = @transform_2, window_bounds = array<i64: 8, 1>}, {transform_indices = @transform_3, window_bounds = array<i64: 8, 128>}]} {
    %c0 = arith.constant 0 : index
    %c0_0 = arith.constant 0 : index
    %0 = vector.load %arg2[%c0, %c0_0] : memref<8x32xbf16, #tpu.memory_space<vmem>>, vector<8x32xbf16>
    %c0_1 = arith.constant 0 : index
    %c0_2 = arith.constant 0 : index
    %1 = vector.load %arg1[%c0_1, %c0_2] : memref<128x32xbf16, #tpu.memory_space<vmem>>, vector<128x32xbf16>
    %cst = arith.constant dense<0.000000e+00> : vector<8x128xf32>
    %2 = tpu.matmul %0, %1, %cst {dimension_numbers = #tpu.dot_dimension_numbers<[1], [1], [0], [0], [0, 0, 1, 0], [], []>} : vector<8x32xbf16>, vector<128x32xbf16>, vector<8x128xf32> -> vector<8x128xf32>
    %c0_3 = arith.constant 0 : index
    %c0_4 = arith.constant 0 : index
    %3 = vector.load %arg3[%c0_3, %c0_4] : memref<8x1xf32, #tpu.memory_space<vmem>>, vector<8x1xf32>
    %4 = vector.broadcast %3 : vector<8x1xf32> to vector<8x128xf32>
    %5 = arith.addf %2, %4 : vector<8x128xf32>
    %c0_5 = arith.constant 0 : index
    %c0_6 = arith.constant 0 : index
    %6 = vector.load %arg4[%c0_5, %c0_6] : memref<8x128xf32, #tpu.memory_space<vmem>>, vector<8x128xf32>
    tpu.vector_store %arg4[%c0_5, %c0_6], %5 {strides = array<i32>} : memref<8x128xf32, #tpu.memory_space<vmem>>, vector<8x128xf32>,
    return
  }
  func.func @transform_0(%arg0: i32) -> (i32, i32) {
    %c0_i32 = arith.constant 0 : i32
    %c0_i32_0 = arith.constant 0 : i32
    return %arg0, %c0_i32 : i32, i32
  }
  func.func @transform_1(%arg0: i32) -> (i32, i32) {
    %c0_i32 = arith.constant 0 : i32
    %c0_i32_0 = arith.constant 0 : i32
    %c0_i32_1 = arith.constant 0 : i32
    return %c0_i32, %c0_i32_0 : i32, i32
  }
  func.func @transform_2(%arg0: i32) -> (i32, i32) {
    %c0_i32 = arith.constant 0 : i32
    %c0_i32_0 = arith.constant 0 : i32
    %c0_i32_1 = arith.constant 0 : i32
    return %c0_i32, %c0_i32_0 : i32, i32
  }
  func.func @transform_3(%arg0: i32) -> (i32, i32) {
    %c0_i32 = arith.constant 0 : i32
    %c0_i32_0 = arith.constant 0 : i32
    return %c0_i32, %arg0 : i32, i32
  }
}

</mosaic_0001>

<bundles_post_ra>
// kernel: tpu_custom_call.1
= control target key start
LH: loop header
LB: loop body
LE: loop exit
PB: predicated region body
PF: predicated region fallthrough
CT: control target
= control target key end

     0   :  { %8 = vsyncpa [#allocation3], 0  ;;  %s628_s0 = inlined_call_operand.vmem [shape: bf16[256,32], index: 0, kind: input, shape index: {}]   ;;  %s629_s1 = inlined_call_operand.vmem [shape: bf16[8,32], index: 1, kind: input, shape index: {}]   ;;  %s630_s2 = inlined_call_operand.vmem [shape: f32[8,1], index: 2, kind: input, shape index: {}]   ;;  %s631_s3 = inlined_call_operand.hbm [shape: f32[8,256], index: 3, kind: output, shape index: {}]  }
   0x1   :  { %10 = vsyncpa [#allocation3 + $0x1], 0  ;;  %s529_s12 = smov 0   ;;  %s531_s13 = smov 0  }
   0x2   :  { %s533_s14 = smov 0   ;;  %s535_s15 = smov 0  }
   0x3 LB: > { %s550_s16 = sadd.s32 4294967295, %s506_s15   ;;  %s351_s17 = sadd.s32 4294967294, %s506_s15   ;;  %s506_s15 = sphi %s535_s15, %s637_s15   ;;  %s502_s14 = sphi %s533_s14, %s636_s14   ;;  %s498_s13 = sphi %s531_s13, %s635_s13   ;;  %s494_s12 = sphi %s529_s12, %s634_s12  }
   0x4   : > { %s554_s18 = sadd.s32 1, %s506_s15   ;;  %s91_s19 = sadd.s32 1, %s502_s14 }
   0x5   : > { %s88_s20 = ssub.s32 %s506_s15, %s554_s18  ;;  %p101_p0 = scmp.ne.s32.totalorder %s502_s14, %s498_s13 }
   0x6   : > { %p89_p1 = scmp.eq.s32.totalorder %s88_s20, 0  ;;  %p102_p2 = scmp.eq.s32.totalorder %s550_s16, 1 }
   0x7   : > { %p107_p3 = scmp.ne.s32.totalorder %s498_s13, %s494_s12  ;;  %p108_p4 = scmp.eq.s32.totalorder %s351_s17, 1 }
   0x8   : > { %s565_s21 = scalar_select %p89_p1, %s502_s14, %s91_s19  }
   0x9   : > { %p567_p5 = por %p102_p2, %p101_p0  ;;  %p571_p6 = por %p108_p4, %p107_p3 }
   0xa   : > { %p354_p7 = scmp.ge.s32.totalorder %s506_s15, 1  ;;  %p141_p8 = scmp.lt.s32.totalorder %s506_s15, 3 }
   0xc   : > { %p142_p9 = pnand %p354_p7, %p141_p8 }
   0xd   : > { %s356_s24 = sshll.u32 (!%p142_p9), %s550_s16, 4  ;;  %s162_s6 = sand.u32 (!%p142_p9), 1, %s498_s13  }
   0xe   : > { %145 = sbr.rel (%p142_p9) target bundleno = 221 (0xdd), region = 32  ;;  %p166_p10 = scmp.lt.s32.totalorder (!%p142_p9), %s356_s24, 31 }
   0xf   : > { %s392_s7 = sshll.u32 (!%p142_p9), %s550_s16, 3  ;;  %s355_s8 = sshll.u32 (!%p142_p9), %s162_s6, 3 }
  0x10   : > { %s287_s11 = scalar_lea.hbm (!%p142_p9), %s631_s3, %s392_s7  ;;  %s164_s17 = scalar_lea.vmem (!%p142_p9), [#allocation2], %s355_s8 }
  0x11   : > { %s289_s19 = sshll.u32 (!%p142_p9), %s164_s17, 4  ;;  %s291_s20 = sshll.u32 (!%p142_p9), %s287_s11, 4  ;;  %s290_s19 = int_to_ptr.vmem [resolvable:$true] %s289_s19  ;;  %s292_s20 = int_to_ptr.hbm [resolvable:$true] %s291_s20 }
  0x13   : > { %s639_s24 = smov (!%p166_p10, %s356_s24), 31  ;;  %vm234_vm0 = vcmask 261120   ;;  %v188_v10 = vld [vmem:[%s630_s2] sm:$0xff]  ;;  %v508_v11 = vmov 0  }
  0x14   : > { %s357_s25 = sshll.u32 %s639_s24, 2  ;;  %443 = vset.pattern.permute.xlu0 %v508_v11  ;;  %v171_v18 = vld [vmem:[%s629_s1] sm:$0xf]  ;;  %s277_s24 = scalar_lea.sflag [#allocation3], %s162_s6 }
  0x15   : > { %s169_s28 = scalar_lea.vmem %s628_s0, %s357_s25  ;;  %191 = vperm.xlu0 %443, %v188_v10   ;;  %s458_s25 = sshra.s32 %s292_s20, 4  ;;  %s459_s25 = int_to_ptr.hbm [resolvable:$true] %s458_s25 }
  0x16   : > { %v402_v0 = vld [vmem:[%s169_s28 + $0x38] sm:$0xff]  ;;  %v401_v2 = vld [vmem:[%s169_s28 + $0x30] sm:$0xff]  ;;  %v400_v4 = vld [vmem:[%s169_s28 + $0x28] sm:$0xff]  ;;  %s460_s26 = scalar_lea.hbm %s459_s25, 8  ;;  %p465_p0 = scmp.lt.s32.totalorder %s459_s25, %s631_s3 }
  0x17   : > { %v260_v1 = vsel %vm234_vm0, %v402_v0, 0  ;;  %v257_v3 = vsel %vm234_vm0, %v401_v2, 0  ;;  %v254_v5 = vsel %vm234_vm0, %v400_v4, 0  ;;  %v399_v6 = vld [vmem:[%s169_s28 + $0x20] sm:$0xff]  ;;  %v398_v8 = vld [vmem:[%s169_s28 + $0x18] sm:$0xff]  ;;  %v397_v12 = vld [vmem:[%s169_s28 + $0x10] sm:$0xff]  ;;  %p461_p11 = scmp.ne.s32.totalorder %s459_s25, %s460_s26 }
  0x18   : > { %262 = vmatpush.bf16.xpose.msra.mxu0 %v260_v1  ;;  %v251_v7 = vsel %vm234_vm0, %v399_v6, 0  ;;  %v248_v9 = vsel %vm234_vm0, %v398_v8, 0  ;;  %v245_v13 = vsel %vm234_vm0, %v397_v12, 0  ;;  %v396_v14 = vld [vmem:[%s169_s28 + $0x8] sm:$0xff]  ;;  %v395_v16 = vld [vmem:[%s169_s28] sm:$0xff]  ;;  %s464_s28 = scalar_lea.hbm %s631_s3, 16 }
  0x19   : > { %v242_v15 = vsel %vm234_vm0, %v396_v14, 0  ;;  %v239_v17 = vsel %vm234_vm0, %v395_v16, 0  ;;  %p462_p12 = pnand %p461_p11, %p567_p5  ;;  %p466_p1 = scmp.lt.s32.totalorder %s464_s28, %s460_s26 }
  0x1b   : > { %p463_p13 = pneg %p462_p12  ;;  %p467_p2 = por %p466_p1, %p465_p0 }
  0x1d   : > { %p468_p3 = pnand %p467_p2, %p463_p13 }
  0x20   : > { %263 = vmatpush.bf16.xpose.msra.mxu0 %v257_v3 }
  0x28   : > { %264 = vmatpush.bf16.xpose.msra.mxu0 %v254_v5 }
  0x30   : > { %265 = vmatpush.bf16.xpose.msra.mxu0 %v251_v7 }
  0x38   : > { %266 = vmatpush.bf16.xpose.msra.mxu0 %v248_v9 }
  0x40   : > { %267 = vmatpush.bf16.xpose.msra.mxu0 %v245_v13 }
  0x48   : > { %268 = vmatpush.bf16.xpose.msra.mxu0 %v242_v15 }
  0x50   : > { %269 = vmatpush.bf16.xpose.msra.mxu0 %v239_v17 }
  0x57   : > { %390 = vmatmul.msk.bf16.vlgmr.msra.gmra.mxu0 %vm234_vm0, %v171_v18 }
  0x87   : > { %v192_v19 = vpop.permute.xlu0 %191 }
  0xd4   : > { %v271_v20 = vpop.f32.mrf.mxu0 }
  0xd5   : > { %v272_v21 = vadd.f32 %v271_v20, %v192_v19 }
  0xd7   : > { %275 = vst [vmem:[%s164_s17] sm:$0xff] %v272_v21 }
  0xd8   : > { %471 = shalt.err (!%p468_p3)
}
  0xd9   : > { %403 = dma.vmem_to_hbm [thread:$0]  (%p567_p5), %s290_s19, 128, %s292_s20, %s277_s24  }
  0xdc   : > { %v273_v22 = vpop.f32.mrf.mxu0 }
  0xdd PF: > { %p409_p4 = scmp.ge.s32.totalorder %s506_s15, 2  ;;  %s303_s4 = sand.u32 1, %s494_s12  }
  0xde   : > { %s304_s5 = scalar_lea.sflag [#allocation3], %s303_s4 }
  0xdf   : > { %p406_p7 = pnand %p409_p4, %p571_p6 }
  0xe1   : > { %p407_p8 = pneg %p406_p7 }
  0xe3   : > { %489 = dma.done.wait (%p407_p8), %s304_s5, 128  }
  0xe4   : > { %491 = vsyncadd (%p407_p8), %s304_s5, 4294967168  ;;  %p13_p9 = scmp.ge.s32.totalorder %s554_s18, 4   ;;  %s634_s12 = smov %s498_s13 }
  0xe5   : > { %s635_s13 = smov %s502_s14  ;;  %s636_s14 = smov %s565_s21 }
  0xe6   : > { %s637_s15 = smov %s554_s18  ;;  %15 = sbr.rel (!%p13_p9) target bundleno = 3 (0x3), region = 67 }
  0xeb   :  { %310 = vsyncpa [#allocation3], 1 }
  0xec   :  { %312 = vsyncpa [#allocation3 + $0x1], 1 }

</bundles_post_ra>
